<compile_context>
chip_gen: v5e
topology: v5e:2x2
jax: 0.10.0
libtpu: 0.0.40
codegen_flags: <defaults>
</compile_context>

<pallas_src>
import math

import numpy as np
import jax
import jax.numpy as jnp
from jax.experimental import pallas as pl
from jax.experimental.pallas import tpu as pltpu


# ----------------------------------------------------------------------------
# Pallas kernels
# ----------------------------------------------------------------------------
def conv1_pool_kernel(pat_ref, w_ref, b_ref, out_ref):
    """conv1 (im2col matmul) + 2x2 maxpool + bias + ReLU for one sample block.

    pat_ref : (4*R, K) rows ordered (pool member p, sample-in-block, position)
    w_ref   : (K, C1)
    b_ref   : (1, C1)
    out_ref : (R, C1) = relu(max_p(pat_p @ w) + b)
    """
    R = out_ref.shape[0]
    # one MXU matmul over all 4 pooling slabs (fills the systolic array 4x
    # better than 4 separate small dots and pays one push/drain latency)
    z = jnp.dot(pat_ref[...], w_ref[...], preferred_element_type=jnp.float32)
    m = jnp.maximum(jnp.maximum(z[0:R], z[R:2 * R]),
                    jnp.maximum(z[2 * R:3 * R], z[3 * R:4 * R]))
    out_ref[...] = jnp.maximum(m + b_ref[...], 0.0)


def tail_kernel(pat_ref, w2_ref, b2_ref, w3_ref, b3_ref, w4_ref, b4_ref,
                w5_ref, b5_ref, out_ref):
    """Fused conv2 + 2x2 maxpool + ReLU + fc1 + fc2 + fc3.

    pat_ref : (4*N, S*K2) rows (pool member p, sample n); lanes (position s, k)
    w2_ref  : (S*K2, S*C2) block-diagonal conv2 weight (one matmul = conv2 at
              every pooled output position)
    b2_ref  : (1, S*C2) conv2 bias tiled per position
    w3/b3   : fc1 (96,120)/(1,120)  [columns pre-permuted to NHWC flatten order]
    w4/b4   : fc2 (120,84)/(1,84)
    w5/b5   : fc3 (84,nc)/(1,nc)
    out_ref : (N, nc)
    """
    N = out_ref.shape[0]
    z = jnp.dot(pat_ref[...], w2_ref[...], preferred_element_type=jnp.float32)
    m = jnp.maximum(jnp.maximum(z[0:N], z[N:2 * N]),
                    jnp.maximum(z[2 * N:3 * N], z[3 * N:4 * N]))
    h = jnp.maximum(m + b2_ref[...], 0.0)                                   # (N, 96)
    h = jnp.maximum(
        jnp.dot(h, w3_ref[...], preferred_element_type=jnp.float32) + b3_ref[...], 0.0)
    h = jnp.maximum(
        jnp.dot(h, w4_ref[...], preferred_element_type=jnp.float32) + b4_ref[...], 0.0)
    out_ref[...] = (
        jnp.dot(h, w5_ref[...], preferred_element_type=jnp.float32) + b5_ref[...])


_VMEM = pl.BlockSpec(memory_space=pltpu.MemorySpace.VMEM)


# ----------------------------------------------------------------------------
# JAX glue (layout only)
# ----------------------------------------------------------------------------
def _im2col_nhwc(x, k):
    """x: (N,H,W,C) -> (N, Hc, Wc, k*k*C) valid-conv patches, K-order (kh, kw, c)."""
    N, H, W, C = x.shape
    Hc, Wc = H - k + 1, W - k + 1
    cols = [x[:, kh:kh + Hc, kw:kw + Wc, :] for kh in range(k) for kw in range(k)]
    return jnp.stack(cols, axis=3).reshape(N, Hc, Wc, k * k * C), Hc, Wc


def conv1_relu_pool(x_nhwc, w, b):
    """x_nhwc: (N,H,W,16), already padded. Returns pooled activations (N,Ho,Wo,6)."""
    N = x_nhwc.shape[0]
    pat, Hc, Wc = _im2col_nhwc(x_nhwc, 3)
    Ho, Wo = Hc // 2, Wc // 2
    R = Ho * Wo                       # pooled positions per sample (48)
    K = pat.shape[-1]                 # 144
    C1 = w.shape[-1]                  # 6
    # block BN samples per grid step (largest divisor of N that is <= 8):
    # amortizes per-step overhead and gives the MXU taller LHS tiles, while a
    # multi-block grid still splits across TensorCores (megacore).
    BN = max(d for d in (8, 4, 2, 1) if N % d == 0)
    nb = N // BN
    # rows ordered (block, pool member p, sample-in-block, ho, wo): each grid
    # block carries its own 4 pooling slabs at sublane-aligned offsets p*BN*R.
    slabs = jnp.stack(
        [pat[:, pi:2 * Ho:2, pj:2 * Wo:2, :] for pi in (0, 1) for pj in (0, 1)],
        axis=0)                                              # (4, N, Ho, Wo, K)
    slabs = slabs.reshape(4, nb, BN * R, K)
    pat_rows = jnp.transpose(slabs, (1, 0, 2, 3)).reshape(nb * 4 * BN * R, K)
    out = pl.pallas_call(
        conv1_pool_kernel,
        out_shape=jax.ShapeDtypeStruct((N * R, C1), jnp.float32),
        grid=(nb,),
        in_specs=[pl.BlockSpec((4 * BN * R, K), lambda i: (i, 0)),
                  pl.BlockSpec((K, C1), lambda i: (0, 0)),
                  pl.BlockSpec((1, C1), lambda i: (0, 0))],
        out_specs=pl.BlockSpec((BN * R, C1), lambda i: (i, 0)),
        compiler_params=pltpu.CompilerParams(dimension_semantics=("parallel",)),
    )(pat_rows, w, b)
    return out.reshape(N, Ho, Wo, C1)


def conv2_fc_head(y1, pp):
    """y1: (N, 6, 8, 6) pooled conv1 activations (NHWC). Returns logits (N, nc)."""
    N = y1.shape[0]
    pat, Hc, Wc = _im2col_nhwc(y1, 3)            # (N, 4, 6, 54)
    Ho, Wo = Hc // 2, Wc // 2                    # 2, 3
    S = Ho * Wo                                  # 6 pooled positions
    K2 = pat.shape[-1]                           # 54
    # slab p = patches of the p-th member of every 2x2 window; per sample, all
    # S positions concatenated along lanes so one block-diag matmul does conv2
    # everywhere and the result is already flattened per sample.
    slabs = [pat[:, pi:2 * Ho:2, pj:2 * Wo:2, :].reshape(N, S * K2)
             for pi in (0, 1) for pj in (0, 1)]
    pat2 = jnp.concatenate(slabs, axis=0)        # (4N, S*K2), rows (p, n)
    nc = pp["fc3_wt"].shape[-1]
    # whole tail fits comfortably in VMEM at these sizes; no grid / no
    # pipelining needed, single launch, zero HBM traffic between fc layers.
    return pl.pallas_call(
        tail_kernel,
        out_shape=jax.ShapeDtypeStruct((N, nc), jnp.float32),
        in_specs=[_VMEM] * 9,
        out_specs=_VMEM,
    )(pat2, pp["conv2_wblk"], pp["conv2_btile"],
      pp["fc1_wt"], pp["fc1_bt"], pp["fc2_wt"], pp["fc2_bt"],
      pp["fc3_wt"], pp["fc3_bt"])


# ----------------------------------------------------------------------------
# Model
# ----------------------------------------------------------------------------
def lenet5_forward(x, pp):
    # x: (N, 16, 1, H, W) -> squeeze dim 2, exactly like the PyTorch module
    x = jnp.squeeze(x, axis=2)                                   # (N, 16, H, W)
    x = jnp.pad(x, ((0, 0), (0, 0), (2, 2), (2, 2)))             # conv1 padding=2
    x = jnp.transpose(x, (0, 2, 3, 1))                           # NHWC (channels on lanes)
    y1 = conv1_relu_pool(x, pp["conv1_wt"], pp["conv1_bt"])      # (N, 6, 8, 6)
    logits = conv2_fc_head(y1, pp)                               # (N, num_classes)
    return logits, {}


def prepare_params(p):
    """One-time conversion of PyTorch-layout params into kernel layouts.

    All transposes / block-diagonal expansion / fc1 column permutation happen
    here (outside the per-forward path), keeping the hot path free of weight
    re-layout ops.
    """
    c1 = p["conv1_w"].shape[0]            # 6
    c2 = p["conv2_w"].shape[0]            # 16
    S = 6                                 # pooled conv2 positions (2*3), fixed by fc1 in=96
    # conv1: im2col K-order (kh, kw, cin) to match NHWC patches
    w1 = jnp.transpose(p["conv1_w"], (2, 3, 1, 0)).reshape(-1, c1)         # (144, 6)
    # conv2 kernel matrix in (kh, kw, cin) K-order, replicated block-diagonally
    # over the S pooled positions -> one matmul evaluates conv2 at every position.
    w2k = jnp.transpose(p["conv2_w"], (2, 3, 1, 0)).reshape(-1, c2)        # (54, 16)
    w2blk = jnp.kron(jnp.eye(S, dtype=w2k.dtype), w2k)                     # (324, 96)
    b2t = jnp.tile(p["conv2_b"], S).reshape(1, S * c2)                     # (1, 96)
    # fc1: permute columns from torch's NCHW flatten order (c, ho, wo) to our
    # lane order (ho, wo, c), and fold in the transpose.
    j = np.arange(S * c2)
    perm = (j % c2) * S + (j // c2)
    fc1_wt = p["fc1_w"][:, perm].T                                         # (96, 120)
    return {
        "conv1_wt": w1, "conv1_bt": p["conv1_b"].reshape(1, c1),
        "conv2_wblk": w2blk, "conv2_btile": b2t,
        "fc1_wt": fc1_wt, "fc1_bt": p["fc1_b"].reshape(1, -1),
        "fc2_wt": p["fc2_w"].T, "fc2_bt": p["fc2_b"].reshape(1, -1),
        "fc3_wt": p["fc3_w"].T, "fc3_bt": p["fc3_b"].reshape(1, -1),
    }


def init_params(key, num_classes=20):
    """Deterministic PyTorch-style (uniform +/- 1/sqrt(fan_in)) init, torch layout."""
    ks = jax.random.split(key, 10)

    def u(k, shape, fan_in):
        bound = 1.0 / math.sqrt(fan_in)
        return jax.random.uniform(k, shape, jnp.float32, -bound, bound)

    return {
        "conv1_w": u(ks[0], (6, 16, 3, 3), 16 * 9),
        "conv1_b": u(ks[1], (6,), 16 * 9),
        "conv2_w": u(ks[2], (16, 6, 3, 3), 6 * 9),
        "conv2_b": u(ks[3], (16,), 6 * 9),
        "fc1_w": u(ks[4], (120, 96), 96),
        "fc1_b": u(ks[5], (120,), 96),
        "fc2_w": u(ks[6], (84, 120), 120),
        "fc2_b": u(ks[7], (84,), 120),
        "fc3_w": u(ks[8], (num_classes, 84), 84),
        "fc3_b": u(ks[9], (num_classes,), 84),
    }


if __name__ == "__main__":
    key = jax.random.PRNGKey(0)
    kx, kp = jax.random.split(key)
    # Spatial 10x14: conv1(pad=2) -> 12x16 -> pool -> 6x8 -> conv2 -> 4x6
    # -> pool -> 2x3; flatten = 16*2*3 = 96 = fc1 input, as the module requires.
    x = jax.random.normal(kx, (2, 16, 1, 10, 14), dtype=jnp.float32)
    params = init_params(kp, num_classes=20)
    pp = prepare_params(params)            # one-time weight re-layout (off the hot path)

    logits, aux = jax.jit(lenet5_forward)(x, pp)
    jax.block_until_ready(logits)

    assert logits.shape == (2, 20), logits.shape
    assert aux == {}
    print("KERNEL_OK")
</pallas_src>

<mosaic_0001>
module attributes {stable_mosaic.version = 11 : i64} {
  func.func @conv1_pool_kernel(%arg0: i32, %arg1: memref<384x144xf32, #tpu.memory_space<vmem>>, %arg2: memref<144x6xf32, #tpu.memory_space<vmem>>, %arg3: memref<1x6xf32, #tpu.memory_space<vmem>>, %arg4: memref<96x6xf32, #tpu.memory_space<vmem>>) attributes {dimension_semantics = [#tpu.dimension_semantics<parallel>], iteration_bounds = array<i64: 1>, scalar_prefetch = 0 : i64, scratch_operands = 0 : i64, tpu.core_type = #tpu.core_type<tc>, window_params = [{transform_indices = @transform_0, window_bounds = array<i64: 384, 144>}, {pipeline_mode = #tpu.pipeline_mode<synchronous>, transform_indices = @transform_1, window_bounds = array<i64: 144, 6>}, {pipeline_mode = #tpu.pipeline_mode<synchronous>, transform_indices = @transform_2, window_bounds = array<i64: 1, 6>}, {transform_indices = @transform_3, window_bounds = array<i64: 96, 6>}]} {
    %c0 = arith.constant 0 : index
    %c0_0 = arith.constant 0 : index
    %0 = vector.load %arg1[%c0, %c0_0] : memref<384x144xf32, #tpu.memory_space<vmem>>, vector<384x144xf32>
    %c0_1 = arith.constant 0 : index
    %c0_2 = arith.constant 0 : index
    %1 = vector.load %arg2[%c0_1, %c0_2] : memref<144x6xf32, #tpu.memory_space<vmem>>, vector<144x6xf32>
    %cst = arith.constant dense<0.000000e+00> : vector<384x6xf32>
    %2 = tpu.matmul %0, %1, %cst {dimension_numbers = #tpu.dot_dimension_numbers<[1], [0], [0], [1], [0, 0, 1, 1], [], []>} : vector<384x144xf32>, vector<144x6xf32>, vector<384x6xf32> -> vector<384x6xf32>
    %3 = vector.extract_strided_slice %2 {offsets = [0, 0], sizes = [96, 6], strides = [1, 1]} : vector<384x6xf32> to vector<96x6xf32>
    %4 = vector.extract_strided_slice %2 {offsets = [96, 0], sizes = [96, 6], strides = [1, 1]} : vector<384x6xf32> to vector<96x6xf32>
    %5 = arith.maximumf %3, %4 : vector<96x6xf32>
    %6 = vector.extract_strided_slice %2 {offsets = [192, 0], sizes = [96, 6], strides = [1, 1]} : vector<384x6xf32> to vector<96x6xf32>
    %7 = vector.extract_strided_slice %2 {offsets = [288, 0], sizes = [96, 6], strides = [1, 1]} : vector<384x6xf32> to vector<96x6xf32>
    %8 = arith.maximumf %6, %7 : vector<96x6xf32>
    %9 = arith.maximumf %5, %8 : vector<96x6xf32>
    %c0_3 = arith.constant 0 : index
    %c0_4 = arith.constant 0 : index
    %10 = vector.load %arg3[%c0_3, %c0_4] : memref<1x6xf32, #tpu.memory_space<vmem>>, vector<1x6xf32>
    %11 = vector.broadcast %10 : vector<1x6xf32> to vector<96x6xf32>
    %12 = arith.addf %9, %11 : vector<96x6xf32>
    %cst_5 = arith.constant 0.000000e+00 : f32
    %13 = vector.broadcast %cst_5 : f32 to vector<96x6xf32>
    %14 = arith.maximumf %12, %13 : vector<96x6xf32>
    %c0_6 = arith.constant 0 : index
    %c0_7 = arith.constant 0 : index
    %15 = vector.load %arg4[%c0_6, %c0_7] : memref<96x6xf32, #tpu.memory_space<vmem>>, vector<96x6xf32>
    tpu.vector_store %arg4[%c0_6, %c0_7], %14 {strides = array<i32>} : memref<96x6xf32, #tpu.memory_space<vmem>>, vector<96x6xf32>,
    return
  }
  func.func @transform_0(%arg0: i32) -> (i32, i32) {
    %c0_i32 = arith.constant 0 : i32
    %c0_i32_0 = arith.constant 0 : i32
    return %arg0, %c0_i32 : i32, i32
  }
  func.func @transform_1(%arg0: i32) -> (i32, i32) {
    %c0_i32 = arith.constant 0 : i32
    %c0_i32_0 = arith.constant 0 : i32
    %c0_i32_1 = arith.constant 0 : i32
    return %c0_i32, %c0_i32_0 : i32, i32
  }
  func.func @transform_2(%arg0: i32) -> (i32, i32) {
    %c0_i32 = arith.constant 0 : i32
    %c0_i32_0 = arith.constant 0 : i32
    %c0_i32_1 = arith.constant 0 : i32
    return %c0_i32, %c0_i32_0 : i32, i32
  }
  func.func @transform_3(%arg0: i32) -> (i32, i32) {
    %c0_i32 = arith.constant 0 : i32
    %c0_i32_0 = arith.constant 0 : i32
    return %arg0, %c0_i32 : i32, i32
  }
}

module attributes {stable_mosaic.version = 11 : i64} {
  func.func @tail_kernel(%arg0: memref<8x324xf32, #tpu.memory_space<vmem>>, %arg1: memref<324x96xf32, #tpu.memory_space<vmem>>, %arg2: memref<1x96xf32, #tpu.memory_space<vmem>>, %arg3: memref<96x120xf32, #tpu.memory_space<vmem>>, %arg4: memref<1x120xf32, #tpu.memory_space<vmem>>, %arg5: memref<120x84xf32, #tpu.memory_space<vmem>>, %arg6: memref<1x84xf32, #tpu.memory_space<vmem>>, %arg7: memref<84x20xf32, #tpu.memory_space<vmem>>, %arg8: memref<1x20xf32, #tpu.memory_space<vmem>>, %arg9: memref<2x20xf32, #tpu.memory_space<vmem>>) attributes {dimension_semantics = [], scalar_prefetch = 0 : i64, scratch_operands = 0 : i64, tpu.core_type = #tpu.core_type<tc>} {
    %c0 = arith.constant 0 : index
    %c0_0 = arith.constant 0 : index
    %0 = vector.load %arg0[%c0, %c0_0] : memref<8x324xf32, #tpu.memory_space<vmem>>, vector<8x324xf32>
    %c0_1 = arith.constant 0 : index
    %c0_2 = arith.constant 0 : index
    %1 = vector.load %arg1[%c0_1, %c0_2] : memref<324x96xf32, #tpu.memory_space<vmem>>, vector<324x96xf32>
    %cst = arith.constant dense<0.000000e+00> : vector<8x96xf32>
    %2 = tpu.matmul %0, %1, %cst {dimension_numbers = #tpu.dot_dimension_numbers<[1], [0], [0], [1], [0, 0, 1, 1], [], []>} : vector<8x324xf32>, vector<324x96xf32>, vector<8x96xf32> -> vector<8x96xf32>
    %3 = vector.extract_strided_slice %2 {offsets = [0, 0], sizes = [2, 96], strides = [1, 1]} : vector<8x96xf32> to vector<2x96xf32>
    %4 = vector.extract_strided_slice %2 {offsets = [2, 0], sizes = [2, 96], strides = [1, 1]} : vector<8x96xf32> to vector<2x96xf32>
    %5 = arith.maximumf %3, %4 : vector<2x96xf32>
    %6 = vector.extract_strided_slice %2 {offsets = [4, 0], sizes = [2, 96], strides = [1, 1]} : vector<8x96xf32> to vector<2x96xf32>
    %7 = vector.extract_strided_slice %2 {offsets = [6, 0], sizes = [2, 96], strides = [1, 1]} : vector<8x96xf32> to vector<2x96xf32>
    %8 = arith.maximumf %6, %7 : vector<2x96xf32>
    %9 = arith.maximumf %5, %8 : vector<2x96xf32>
    %c0_3 = arith.constant 0 : index
    %c0_4 = arith.constant 0 : index
    %10 = vector.load %arg2[%c0_3, %c0_4] : memref<1x96xf32, #tpu.memory_space<vmem>>, vector<1x96xf32>
    %11 = vector.broadcast %10 : vector<1x96xf32> to vector<2x96xf32>
    %12 = arith.addf %9, %11 : vector<2x96xf32>
    %cst_5 = arith.constant 0.000000e+00 : f32
    %13 = vector.broadcast %cst_5 : f32 to vector<2x96xf32>
    %14 = arith.maximumf %12, %13 : vector<2x96xf32>
    %c0_6 = arith.constant 0 : index
    %c0_7 = arith.constant 0 : index
    %15 = vector.load %arg3[%c0_6, %c0_7] : memref<96x120xf32, #tpu.memory_space<vmem>>, vector<96x120xf32>
    %cst_8 = arith.constant dense<0.000000e+00> : vector<2x120xf32>
    %16 = tpu.matmul %14, %15, %cst_8 {dimension_numbers = #tpu.dot_dimension_numbers<[1], [0], [0], [1], [0, 0, 1, 1], [], []>} : vector<2x96xf32>, vector<96x120xf32>, vector<2x120xf32> -> vector<2x120xf32>
    %c0_9 = arith.constant 0 : index
    %c0_10 = arith.constant 0 : index
    %17 = vector.load %arg4[%c0_9, %c0_10] : memref<1x120xf32, #tpu.memory_space<vmem>>, vector<1x120xf32>
    %18 = vector.broadcast %17 : vector<1x120xf32> to vector<2x120xf32>
    %19 = arith.addf %16, %18 : vector<2x120xf32>
    %cst_11 = arith.constant 0.000000e+00 : f32
    %20 = vector.broadcast %cst_11 : f32 to vector<2x120xf32>
    %21 = arith.maximumf %19, %20 : vector<2x120xf32>
    %c0_12 = arith.constant 0 : index
    %c0_13 = arith.constant 0 : index
    %22 = vector.load %arg5[%c0_12, %c0_13] : memref<120x84xf32, #tpu.memory_space<vmem>>, vector<120x84xf32>
    %cst_14 = arith.constant dense<0.000000e+00> : vector<2x84xf32>
    %23 = tpu.matmul %21, %22, %cst_14 {dimension_numbers = #tpu.dot_dimension_numbers<[1], [0], [0], [1], [0, 0, 1, 1], [], []>} : vector<2x120xf32>, vector<120x84xf32>, vector<2x84xf32> -> vector<2x84xf32>
    %c0_15 = arith.constant 0 : index
    %c0_16 = arith.constant 0 : index
    %24 = vector.load %arg6[%c0_15, %c0_16] : memref<1x84xf32, #tpu.memory_space<vmem>>, vector<1x84xf32>
    %25 = vector.broadcast %24 : vector<1x84xf32> to vector<2x84xf32>
    %26 = arith.addf %23, %25 : vector<2x84xf32>
    %cst_17 = arith.constant 0.000000e+00 : f32
    %27 = vector.broadcast %cst_17 : f32 to vector<2x84xf32>
    %28 = arith.maximumf %26, %27 : vector<2x84xf32>
    %c0_18 = arith.constant 0 : index
    %c0_19 = arith.constant 0 : index
    %29 = vector.load %arg7[%c0_18, %c0_19] : memref<84x20xf32, #tpu.memory_space<vmem>>, vector<84x20xf32>
    %cst_20 = arith.constant dense<0.000000e+00> : vector<2x20xf32>
    %30 = tpu.matmul %28, %29, %cst_20 {dimension_numbers = #tpu.dot_dimension_numbers<[1], [0], [0], [1], [0, 0, 1, 1], [], []>} : vector<2x84xf32>, vector<84x20xf32>, vector<2x20xf32> -> vector<2x20xf32>
    %c0_21 = arith.constant 0 : index
    %c0_22 = arith.constant 0 : index
    %31 = vector.load %arg8[%c0_21, %c0_22] : memref<1x20xf32, #tpu.memory_space<vmem>>, vector<1x20xf32>
    %32 = vector.broadcast %31 : vector<1x20xf32> to vector<2x20xf32>
    %33 = arith.addf %30, %32 : vector<2x20xf32>
    %c0_23 = arith.constant 0 : index
    %c0_24 = arith.constant 0 : index
    %34 = vector.load %arg9[%c0_23, %c0_24] : memref<2x20xf32, #tpu.memory_space<vmem>>, vector<2x20xf32>
    tpu.vector_store %arg9[%c0_23, %c0_24], %33 {strides = array<i32>} : memref<2x20xf32, #tpu.memory_space<vmem>>, vector<2x20xf32>,
    return
  }
}

</mosaic_0001>

<bundles_post_ra>
// kernel: lenet5_forward.2
= control target key start
LH: loop header
LB: loop body
LE: loop exit
PB: predicated region body
PF: predicated region fallthrough
CT: control target
= control target key end

     0   :  { %vm128_vm0 = vcmask 130048   ;;  %vm659_vm1 = vcmask 48128   ;;  %s1353_s1 = inlined_call_operand.vmem [shape: f32[144,6], index: 1, kind: input, shape index: {}]   ;;  %s1354_s0 = inlined_call_operand.vmem [shape: f32[384,144], index: 0, kind: input, shape index: {}]   ;;  %s1355_s2 = inlined_call_operand.vmem [shape: f32[1,6], index: 2, kind: input, shape index: {}]   ;;  %s1356_s3 = inlined_call_operand.vmem [shape: f32[96,6], index: 3, kind: output, shape index: {}]  }
   0x1   :  { %v125_v0 = vld [vmem:[%s1353_s1 + $0x78] sm:$0xff]  ;;  %v785_v1 = vld [vmem:[%s1353_s1 + $0x88] sm:$0xff]  ;;  %v124_v2 = vld [vmem:[%s1353_s1 + $0x70] sm:$0xff] }
   0x2   :  { %273 = vmatpush.msra.mxu0 %v125_v0  ;;  %724 = vmatpush.msra.mxu2 %v125_v0  ;;  %v793_v3 = vld [vmem:[%s1353_s1 + $0x80] sm:$0xff]  ;;  %v15_v4 = vld [vmem:[%s1354_s0 + $0x8] sm:$0xff]  ;;  %v121_v7 = vld [vmem:[%s1353_s1 + $0x58] sm:$0xff] }
   0x3   :  { %725 = vmatpush.msra.mxu3 %v125_v0  ;;  %448 = vmatpush.msra.mxu1 %v785_v1  ;;  %v123_v5 = vld [vmem:[%s1353_s1 + $0x68] sm:$0xff]  ;;  %v122_v6 = vld [vmem:[%s1353_s1 + $0x60] sm:$0xff]  ;;  %v120_v8 = vld [vmem:[%s1353_s1 + $0x50] sm:$0xff] }
   0x4   :  { %274 = vmatpush.msra.mxu0 %v124_v2  ;;  %726 = vmatpush.msra.mxu2 %v124_v2  ;;  %v17_v9 = vld [vmem:[%s1354_s0 + $0x18] sm:$0xff]  ;;  %v119_v10 = vld [vmem:[%s1353_s1 + $0x48] sm:$0xff]  ;;  %v118_v11 = vld [vmem:[%s1353_s1 + $0x40] sm:$0xff] }
   0x5   :  { %727 = vmatpush.msra.mxu3 %v124_v2  ;;  %449 = vmatpush.msra.mxu1 %v793_v3  ;;  %v117_v12 = vld [vmem:[%s1353_s1 + $0x38] sm:$0xff]  ;;  %v116_v13 = vld [vmem:[%s1353_s1 + $0x30] sm:$0xff]  ;;  %v19_v14 = vld [vmem:[%s1354_s0 + $0x28] sm:$0xff] }
   0x6   :  { %676 = vmatmul.msk.f32.vlgmr.msra.gmra.mxu1 %vm128_vm0, %v15_v4  ;;  %275 = vmatpush.msra.mxu0 %v123_v5  ;;  %v115_v15 = vld [vmem:[%s1353_s1 + $0x28] sm:$0xff]  ;;  %v114_v16 = vld [vmem:[%s1353_s1 + $0x20] sm:$0xff]  ;;  %v113_v17 = vld [vmem:[%s1353_s1 + $0x18] sm:$0xff] }
   0x7   :  { %728 = vmatpush.msra.mxu2 %v123_v5  ;;  %729 = vmatpush.msra.mxu3 %v123_v5  ;;  %v112_v18 = vld [vmem:[%s1353_s1 + $0x10] sm:$0xff]  ;;  %v21_v19 = vld [vmem:[%s1354_s0 + $0x38] sm:$0xff]  ;;  %v111_v20 = vld [vmem:[%s1353_s1 + $0x8] sm:$0xff] }
   0x8   :  { %276 = vmatpush.msra.mxu0 %v122_v6  ;;  %v110_v21 = vld [vmem:[%s1353_s1] sm:$0xff]  ;;  %v60_v23 = vld [vmem:[%s1354_s0 + $0x170] sm:$0xff]  ;;  %v23_v25 = vld [vmem:[%s1354_s0 + $0x48] sm:$0xff] }
   0x9   :  { %730 = vmatpush.msra.mxu2 %v122_v6  ;;  %731 = vmatpush.msra.mxu3 %v122_v6  ;;  %v14_v22 = vld [vmem:[%s1354_s0] sm:$0xff]  ;;  %v108_v24 = vld [vmem:[%s1354_s0 + $0x2f0] sm:$0xff]  ;;  %v67_v28 = vld [vmem:[%s1354_s0 + $0x1a8] sm:$0xff] }
   0xa   :  { %277 = vmatpush.msra.mxu0 %v121_v7  ;;  %v16_v26 = vld [vmem:[%s1354_s0 + $0x10] sm:$0xff]  ;;  %v62_v27 = vld [vmem:[%s1354_s0 + $0x180] sm:$0xff]  ;;  %v25_v29 = vld [vmem:[%s1354_s0 + $0x58] sm:$0xff] }
   0xb   :  { %732 = vmatpush.msra.mxu2 %v121_v7  ;;  %733 = vmatpush.msra.mxu3 %v121_v7  ;;  %v18_v30 = vld [vmem:[%s1354_s0 + $0x20] sm:$0xff]  ;;  %v64_v31 = vld [vmem:[%s1354_s0 + $0x190] sm:$0xff]  ;;  %v69_v32 = vld [vmem:[%s1354_s0 + $0x1b8] sm:$0xff] }
   0xc   :  { %278 = vmatpush.msra.mxu0 %v120_v8  ;;  %v27_v33 = vld [vmem:[%s1354_s0 + $0x68] sm:$0xff]  ;;  %v20_v34 = vld [vmem:[%s1354_s0 + $0x30] sm:$0xff]  ;;  %v66_v35 = vld [vmem:[%s1354_s0 + $0x1a0] sm:$0xff] }
   0xd   :  { %734 = vmatpush.msra.mxu2 %v120_v8  ;;  %735 = vmatpush.msra.mxu3 %v120_v8  ;;  %v71_v36 = vld [vmem:[%s1354_s0 + $0x1c8] sm:$0xff]  ;;  %v29_v37 = vld [vmem:[%s1354_s0 + $0x78] sm:$0xff]  ;;  %v22_v38 = vld [vmem:[%s1354_s0 + $0x40] sm:$0xff] }
   0xe   :  { %677 = vmatmul.msk.f32.gmra.mxu1 %vm128_vm0, %v17_v9  ;;  %279 = vmatpush.msra.mxu0 %v119_v10  ;;  %v68_v39 = vld [vmem:[%s1354_s0 + $0x1b0] sm:$0xff]  ;;  %v73_v40 = vld [vmem:[%s1354_s0 + $0x1d8] sm:$0xff]  ;;  %v31_v41 = vld [vmem:[%s1354_s0 + $0x88] sm:$0xff] }
   0xf   :  { %736 = vmatpush.msra.mxu2 %v119_v10  ;;  %737 = vmatpush.msra.mxu3 %v119_v10  ;;  %v24_v42 = vld [vmem:[%s1354_s0 + $0x50] sm:$0xff]  ;;  %v70_v43 = vld [vmem:[%s1354_s0 + $0x1c0] sm:$0xff]  ;;  %v75_v44 = vld [vmem:[%s1354_s0 + $0x1e8] sm:$0xff] }
  0x10   :  { %280 = vmatpush.msra.mxu0 %v118_v11  ;;  %v33_v45 = vld [vmem:[%s1354_s0 + $0x98] sm:$0xff]  ;;  %v26_v46 = vld [vmem:[%s1354_s0 + $0x60] sm:$0xff]  ;;  %v72_v47 = vld [vmem:[%s1354_s0 + $0x1d0] sm:$0xff] }
  0x11   :  { %738 = vmatpush.msra.mxu2 %v118_v11  ;;  %739 = vmatpush.msra.mxu3 %v118_v11  ;;  %v77_v48 = vld [vmem:[%s1354_s0 + $0x1f8] sm:$0xff]  ;;  %v35_v49 = vld [vmem:[%s1354_s0 + $0xa8] sm:$0xff]  ;;  %v28_v50 = vld [vmem:[%s1354_s0 + $0x70] sm:$0xff] }
  0x12   :  { %281 = vmatpush.msra.mxu0 %v117_v12  ;;  %v74_v51 = vld [vmem:[%s1354_s0 + $0x1e0] sm:$0xff]  ;;  %v79_v52 = vld [vmem:[%s1354_s0 + $0x208] sm:$0xff]  ;;  %v37_v53 = vld [vmem:[%s1354_s0 + $0xb8] sm:$0xff] }
  0x13   :  { %740 = vmatpush.msra.mxu2 %v117_v12  ;;  %741 = vmatpush.msra.mxu3 %v117_v12  ;;  %v30_v54 = vld [vmem:[%s1354_s0 + $0x80] sm:$0xff]  ;;  %v76_v55 = vld [vmem:[%s1354_s0 + $0x1f0] sm:$0xff]  ;;  %v81_v56 = vld [vmem:[%s1354_s0 + $0x218] sm:$0xff] }
  0x14   :  { %282 = vmatpush.msra.mxu0 %v116_v13  ;;  %v39_v57 = vld [vmem:[%s1354_s0 + $0xc8] sm:$0xff]  ;;  %v32_v58 = vld [vmem:[%s1354_s0 + $0x90] sm:$0xff]  ;;  %v78_v59 = vld [vmem:[%s1354_s0 + $0x200] sm:$0xff] }
  0x15   :  { %742 = vmatpush.msra.mxu2 %v116_v13  ;;  %743 = vmatpush.msra.mxu3 %v116_v13  ;;  %v83_v60 = vld [vmem:[%s1354_s0 + $0x228] sm:$0xff]  ;;  %v41_v61 = vld [vmem:[%s1354_s0 + $0xd8] sm:$0xff]  ;;  %v34_v62 = vld [vmem:[%s1354_s0 + $0xa0] sm:$0xff] }
  0x16   :  { %678 = vmatmul.msk.f32.gmra.mxu1 %vm128_vm0, %v19_v14  ;;  %283 = vmatpush.msra.mxu0 %v115_v15  ;;  %v80_v63 = vld [vmem:[%s1354_s0 + $0x210] sm:$0xff]  ;;  %v85_v0 = vld [vmem:[%s1354_s0 + $0x238] sm:$0xff]  ;;  %v87_v4 = vld [vmem:[%s1354_s0 + $0x248] sm:$0xff] }
  0x17   :  { %744 = vmatpush.msra.mxu2 %v115_v15  ;;  %745 = vmatpush.msra.mxu3 %v115_v15  ;;  %v36_v2 = vld [vmem:[%s1354_s0 + $0xb0] sm:$0xff]  ;;  %v45_v5 = vld [vmem:[%s1354_s0 + $0xf8] sm:$0xff]  ;;  %v38_v6 = vld [vmem:[%s1354_s0 + $0xc0] sm:$0xff] }
  0x18   :  { %284 = vmatpush.msra.mxu0 %v114_v16  ;;  %v84_v7 = vld [vmem:[%s1354_s0 + $0x230] sm:$0xff]  ;;  %v89_v8 = vld [vmem:[%s1354_s0 + $0x258] sm:$0xff]  ;;  %v47_v10 = vld [vmem:[%s1354_s0 + $0x108] sm:$0xff] }
  0x19   :  { %746 = vmatpush.msra.mxu2 %v114_v16  ;;  %747 = vmatpush.msra.mxu3 %v114_v16  ;;  %v40_v11 = vld [vmem:[%s1354_s0 + $0xd0] sm:$0xff]  ;;  %v86_v12 = vld [vmem:[%s1354_s0 + $0x240] sm:$0xff]  ;;  %v91_v13 = vld [vmem:[%s1354_s0 + $0x268] sm:$0xff] }
  0x1a   :  { %285 = vmatpush.msra.mxu0 %v113_v17  ;;  %v49_v15 = vld [vmem:[%s1354_s0 + $0x118] sm:$0xff]  ;;  %v42_v16 = vld [vmem:[%s1354_s0 + $0xe0] sm:$0xff] }
  0x1b   :  { %748 = vmatpush.msra.mxu2 %v113_v17  ;;  %749 = vmatpush.msra.mxu3 %v113_v17  ;;  %v88_v17 = vld [vmem:[%s1354_s0 + $0x250] sm:$0xff] }
  0x1c   :  { %286 = vmatpush.msra.mxu0 %v112_v18 }
  0x1d   :  { %750 = vmatpush.msra.mxu2 %v112_v18  ;;  %751 = vmatpush.msra.mxu3 %v112_v18  ;;  %v93_v18 = vld [vmem:[%s1354_s0 + $0x278] sm:$0xff] }
  0x1e   :  { %679 = vmatmul.msk.f32.gmra.mxu1 %vm128_vm0, %v21_v19  ;;  %287 = vmatpush.msra.mxu0 %v111_v20 }
  0x1f   :  { %752 = vmatpush.msra.mxu2 %v111_v20  ;;  %753 = vmatpush.msra.mxu3 %v111_v20  ;;  %v51_v20 = vld [vmem:[%s1354_s0 + $0x128] sm:$0xff] }
  0x20   :  { %288 = vmatpush.msra.mxu0 %v110_v21 }
  0x21   :  { %754 = vmatpush.msra.mxu2 %v110_v21  ;;  %755 = vmatpush.msra.mxu3 %v110_v21  ;;  %v44_v21 = vld [vmem:[%s1354_s0 + $0xf0] sm:$0xff] }
  0x22   :  { %289 = vmatmul.f32.vlgmr.msra.gmra.mxu0 %v14_v22  ;;  %358 = vmatmul.f32.vlgmr.msra.gmra.mxu2 %v60_v23  ;;  %v90_v22 = vld [vmem:[%s1354_s0 + $0x260] sm:$0xff]  ;;  %v95_v23 = vld [vmem:[%s1354_s0 + $0x288] sm:$0xff] }
  0x23   :  { %430 = vmatmul.f32.vlgmr.msra.gmra.mxu3 %v108_v24 }
  0x24   :  { %756 = vmatpush.msrb.mxu3 %v785_v1  ;;  %v43_v1 = vld [vmem:[%s1354_s0 + $0xe8] sm:$0xff] }
  0x26   :  { %680 = vmatmul.msk.f32.gmra.mxu1 %vm128_vm0, %v23_v25  ;;  %757 = vmatpush.msrb.mxu3 %v793_v3  ;;  %v82_v3 = vld [vmem:[%s1354_s0 + $0x220] sm:$0xff]  ;;  %v53_v25 = vld [vmem:[%s1354_s0 + $0x138] sm:$0xff] }
  0x2a   :  { %292 = vmatmul.f32.gmra.mxu0 %v16_v26  ;;  %361 = vmatmul.f32.gmra.mxu2 %v62_v27  ;;  %v46_v27 = vld [vmem:[%s1354_s0 + $0x100] sm:$0xff] }
  0x2b   :  { %702 = vmatmul.msk.f32.vlgmr.msrb.gmra.mxu3 %vm128_vm0, %v67_v28  ;;  %v92_v28 = vld [vmem:[%s1354_s0 + $0x270] sm:$0xff] }
  0x2e   :  { %681 = vmatmul.msk.f32.gmra.mxu1 %vm128_vm0, %v25_v29 }
  0x32   :  { %295 = vmatmul.f32.gmra.mxu0 %v18_v30  ;;  %364 = vmatmul.f32.gmra.mxu2 %v64_v31  ;;  %v97_v30 = vld [vmem:[%s1354_s0 + $0x298] sm:$0xff] }
  0x33   :  { %703 = vmatmul.msk.f32.gmra.mxu3 %vm128_vm0, %v69_v32  ;;  %v55_v32 = vld [vmem:[%s1354_s0 + $0x148] sm:$0xff] }
  0x36   :  { %682 = vmatmul.msk.f32.gmra.mxu1 %vm128_vm0, %v27_v33 }
  0x3a   :  { %298 = vmatmul.f32.gmra.mxu0 %v20_v34  ;;  %367 = vmatmul.f32.gmra.mxu2 %v66_v35 }
  0x3b   :  { %704 = vmatmul.msk.f32.gmra.mxu3 %vm128_vm0, %v71_v36  ;;  %v48_v36 = vld [vmem:[%s1354_s0 + $0x110] sm:$0xff] }
  0x3e   :  { %683 = vmatmul.msk.f32.gmra.mxu1 %vm128_vm0, %v29_v37  ;;  %v94_v37 = vld [vmem:[%s1354_s0 + $0x280] sm:$0xff] }
  0x42   :  { %301 = vmatmul.f32.gmra.mxu0 %v22_v38  ;;  %370 = vmatmul.f32.gmra.mxu2 %v68_v39  ;;  %v99_v39 = vld [vmem:[%s1354_s0 + $0x2a8] sm:$0xff] }
  0x43   :  { %705 = vmatmul.msk.f32.gmra.mxu3 %vm128_vm0, %v73_v40 }
  0x46   :  { %684 = vmatmul.msk.f32.gmra.mxu1 %vm128_vm0, %v31_v41  ;;  %v57_v41 = vld [vmem:[%s1354_s0 + $0x158] sm:$0xff] }
  0x4a   :  { %304 = vmatmul.f32.gmra.mxu0 %v24_v42  ;;  %373 = vmatmul.f32.gmra.mxu2 %v70_v43 }
  0x4b   :  { %706 = vmatmul.msk.f32.gmra.mxu3 %vm128_vm0, %v75_v44 }
  0x4e   :  { %685 = vmatmul.msk.f32.gmra.mxu1 %vm128_vm0, %v33_v45  ;;  %v50_v45 = vld [vmem:[%s1354_s0 + $0x120] sm:$0xff] }
  0x52   :  { %307 = vmatmul.f32.gmra.mxu0 %v26_v46  ;;  %376 = vmatmul.f32.gmra.mxu2 %v72_v47  ;;  %v96_v46 = vld [vmem:[%s1354_s0 + $0x290] sm:$0xff] }
  0x53   :  { %707 = vmatmul.msk.f32.gmra.mxu3 %vm128_vm0, %v77_v48  ;;  %v101_v48 = vld [vmem:[%s1354_s0 + $0x2b8] sm:$0xff] }
  0x56   :  { %686 = vmatmul.msk.f32.gmra.mxu1 %vm128_vm0, %v35_v49 }
  0x5a   :  { %310 = vmatmul.f32.gmra.mxu0 %v28_v50  ;;  %379 = vmatmul.f32.gmra.mxu2 %v74_v51  ;;  %v59_v50 = vld [vmem:[%s1354_s0 + $0x168] sm:$0xff] }
  0x5b   :  { %708 = vmatmul.msk.f32.gmra.mxu3 %vm128_vm0, %v79_v52 }
  0x5e   :  { %687 = vmatmul.msk.f32.gmra.mxu1 %vm128_vm0, %v37_v53 }
  0x62   :  { %313 = vmatmul.f32.gmra.mxu0 %v30_v54  ;;  %382 = vmatmul.f32.gmra.mxu2 %v76_v55  ;;  %v52_v54 = vld [vmem:[%s1354_s0 + $0x130] sm:$0xff]  ;;  %v98_v55 = vld [vmem:[%s1354_s0 + $0x2a0] sm:$0xff] }
  0x63   :  { %709 = vmatmul.msk.f32.gmra.mxu3 %vm128_vm0, %v81_v56 }
  0x66   :  { %688 = vmatmul.msk.f32.gmra.mxu1 %vm128_vm0, %v39_v57  ;;  %v103_v57 = vld [vmem:[%s1354_s0 + $0x2c8] sm:$0xff] }
  0x6a   :  { %316 = vmatmul.f32.gmra.mxu0 %v32_v58  ;;  %385 = vmatmul.f32.gmra.mxu2 %v78_v59  ;;  %v61_v59 = vld [vmem:[%s1354_s0 + $0x178] sm:$0xff] }
  0x6b   :  { %710 = vmatmul.msk.f32.gmra.mxu3 %vm128_vm0, %v83_v60 }
  0x6e   :  { %689 = vmatmul.msk.f32.gmra.mxu1 %vm128_vm0, %v41_v61 }
  0x72   :  { %319 = vmatmul.f32.gmra.mxu0 %v34_v62  ;;  %388 = vmatmul.f32.gmra.mxu2 %v80_v63 }
  0x73   :  { %711 = vmatmul.msk.f32.gmra.mxu3 %vm128_vm0, %v85_v0  ;;  %v54_v0 = vld [vmem:[%s1354_s0 + $0x140] sm:$0xff] }
  0x76   :  { %690 = vmatmul.msk.f32.gmra.mxu1 %vm128_vm0, %v43_v1  ;;  %v100_v1 = vld [vmem:[%s1354_s0 + $0x2b0] sm:$0xff] }
  0x7a   :  { %322 = vmatmul.f32.gmra.mxu0 %v36_v2  ;;  %391 = vmatmul.f32.gmra.mxu2 %v82_v3  ;;  %v105_v3 = vld [vmem:[%s1354_s0 + $0x2d8] sm:$0xff] }
  0x7b   :  { %712 = vmatmul.msk.f32.gmra.mxu3 %vm128_vm0, %v87_v4 }
  0x7e   :  { %691 = vmatmul.msk.f32.gmra.mxu1 %vm128_vm0, %v45_v5  ;;  %v63_v5 = vld [vmem:[%s1354_s0 + $0x188] sm:$0xff] }
  0x82   :  { %325 = vmatmul.f32.gmra.mxu0 %v38_v6  ;;  %394 = vmatmul.f32.gmra.mxu2 %v84_v7 }
  0x83   :  { %713 = vmatmul.msk.f32.gmra.mxu3 %vm128_vm0, %v89_v8  ;;  %v451_v9 = vpop.f32.mrf.mxu1 }
  0x86   :  { %692 = vmatmul.msk.f32.gmra.mxu1 %vm128_vm0, %v47_v10  ;;  %v56_v10 = vld [vmem:[%s1354_s0 + $0x150] sm:$0xff] }
  0x8a   :  { %328 = vmatmul.f32.gmra.mxu0 %v40_v11  ;;  %397 = vmatmul.f32.gmra.mxu2 %v86_v12  ;;  %v102_v11 = vld [vmem:[%s1354_s0 + $0x2c0] sm:$0xff] }
  0x8b   :  { %714 = vmatmul.msk.f32.gmra.mxu3 %vm128_vm0, %v91_v13  ;;  %v454_v14 = vpop.f32.mrf.mxu1  ;;  %v107_v13 = vld [vmem:[%s1354_s0 + $0x2e8] sm:$0xff] }
  0x8e   :  { %693 = vmatmul.msk.f32.gmra.mxu1 %vm128_vm0, %v49_v15  ;;  %v65_v15 = vld [vmem:[%s1354_s0 + $0x198] sm:$0xff] }
  0x92   :  { %331 = vmatmul.f32.gmra.mxu0 %v42_v16  ;;  %400 = vmatmul.f32.gmra.mxu2 %v88_v17 }
  0x93   :  { %715 = vmatmul.msk.f32.gmra.mxu3 %vm128_vm0, %v93_v18  ;;  %v457_v19 = vpop.f32.mrf.mxu1 }
  0x96   :  { %694 = vmatmul.msk.f32.gmra.mxu1 %vm128_vm0, %v51_v20  ;;  %v58_v20 = vld [vmem:[%s1354_s0 + $0x160] sm:$0xff] }
  0x9a   :  { %334 = vmatmul.f32.gmra.mxu0 %v44_v21  ;;  %403 = vmatmul.f32.gmra.mxu2 %v90_v22  ;;  %v104_v21 = vld [vmem:[%s1354_s0 + $0x2d0] sm:$0xff] }
  0x9b   :  { %716 = vmatmul.msk.f32.gmra.mxu3 %vm128_vm0, %v95_v23  ;;  %v460_v24 = vpop.f32.mrf.mxu1  ;;  %v109_v23 = vld [vmem:[%s1354_s0 + $0x2f8] sm:$0xff] }
  0x9e   :  { %695 = vmatmul.msk.f32.gmra.mxu1 %vm128_vm0, %v53_v25 }
  0x9f   :  { %v290_v26 = vpop.f32.mrf.mxu0 }
  0xa0   :  { %v1086_v29 = vadd.f32 %v451_v9, %v290_v26 }
  0xa2   :  { %337 = vmatmul.f32.gmra.mxu0 %v46_v27  ;;  %406 = vmatmul.f32.gmra.mxu2 %v92_v28 }
  0xa3   :  { %717 = vmatmul.msk.f32.gmra.mxu3 %vm128_vm0, %v97_v30  ;;  %v463_v31 = vpop.f32.mrf.mxu1  ;;  %v106_v30 = vld [vmem:[%s1354_s0 + $0x2e0] sm:$0xff] }
  0xa5   :  { %v1095_v33 = vpop.f32.mrf.mxu2 }
  0xa6   :  { %v1097_v34 = vpop.f32.mrf.mxu3  ;;  %696 = vmatmul.msk.f32.gmra.mxu1 %vm128_vm0, %v55_v32 }
  0xa7   :  { %v293_v35 = vpop.f32.mrf.mxu0 }
  0xa8   :  { %v1106_v38 = vadd.f32 %v454_v14, %v293_v35 }
  0xaa   :  { %340 = vmatmul.f32.gmra.mxu0 %v48_v36  ;;  %409 = vmatmul.f32.gmra.mxu2 %v94_v37 }
  0xab   :  { %718 = vmatmul.msk.f32.gmra.mxu3 %vm128_vm0, %v99_v39  ;;  %v466_v40 = vpop.f32.mrf.mxu1 }
  0xad   :  { %v1115_v42 = vpop.f32.mrf.mxu2 }
  0xae   :  { %v529_v43 = vpop.f32.mrf.mxu3  ;;  %697 = vmatmul.msk.f32.gmra.mxu1 %vm128_vm0, %v57_v41 }
  0xaf   :  { %v296_v44 = vpop.f32.mrf.mxu0 }
  0xb0   :  { %v1124_v47 = vadd.f32 %v457_v19, %v296_v44 }
  0xb2   :  { %343 = vmatmul.f32.gmra.mxu0 %v50_v45  ;;  %412 = vmatmul.f32.gmra.mxu2 %v96_v46 }
  0xb3   :  { %719 = vmatmul.msk.f32.gmra.mxu3 %vm128_vm0, %v101_v48  ;;  %v469_v49 = vpop.f32.mrf.mxu1 }
  0xb5   :  { %v1133_v51 = vpop.f32.mrf.mxu2 }
  0xb6   :  { %v532_v52 = vpop.f32.mrf.mxu3  ;;  %698 = vmatmul.msk.f32.gmra.mxu1 %vm128_vm0, %v59_v50 }
  0xb7   :  { %v299_v53 = vpop.f32.mrf.mxu0 }
  0xb8   :  { %v1142_v56 = vadd.f32 %v460_v24, %v299_v53 }
  0xba   :  { %346 = vmatmul.f32.gmra.mxu0 %v52_v54  ;;  %415 = vmatmul.f32.gmra.mxu2 %v98_v55 }
  0xbb   :  { %720 = vmatmul.msk.f32.gmra.mxu3 %vm128_vm0, %v103_v57  ;;  %v472_v58 = vpop.f32.mrf.mxu1 }
  0xbd   :  { %v368_v60 = vpop.f32.mrf.mxu2 }
  0xbe   :  { %v1151_v61 = vadd.f32 %v529_v43, %v368_v60  ;;  %v535_v62 = vpop.f32.mrf.mxu3  ;;  %699 = vmatmul.msk.f32.gmra.mxu1 %vm128_vm0, %v61_v59 }
  0xbf   :  { %v302_v63 = vpop.f32.mrf.mxu0 }
  0xc0   :  { %v1160_v2 = vadd.f32 %v463_v31, %v302_v63 }
  0xc2   :  { %349 = vmatmul.f32.gmra.mxu0 %v54_v0  ;;  %418 = vmatmul.f32.gmra.mxu2 %v100_v1 }
  0xc3   :  { %721 = vmatmul.msk.f32.gmra.mxu3 %vm128_vm0, %v105_v3  ;;  %v475_v4 = vpop.f32.mrf.mxu1 }
  0xc5   :  { %v371_v6 = vpop.f32.mrf.mxu2 }
  0xc6   :  { %v1169_v7 = vadd.f32 %v532_v52, %v371_v6  ;;  %v538_v8 = vpop.f32.mrf.mxu3  ;;  %700 = vmatmul.msk.f32.gmra.mxu1 %vm128_vm0, %v63_v5 }
  0xc7   :  { %v305_v9 = vpop.f32.mrf.mxu0 }
  0xc8   :  { %v1178_v12 = vadd.f32 %v466_v40, %v305_v9 }
  0xca   :  { %352 = vmatmul.f32.gmra.mxu0 %v56_v10  ;;  %421 = vmatmul.f32.gmra.mxu2 %v102_v11 }
  0xcb   :  { %722 = vmatmul.msk.f32.gmra.mxu3 %vm128_vm0, %v107_v13  ;;  %v478_v14 = vpop.f32.mrf.mxu1 }
  0xcd   :  { %v374_v16 = vpop.f32.mrf.mxu2 }
  0xce   :  { %v1187_v17 = vadd.f32 %v535_v62, %v374_v16  ;;  %v541_v18 = vpop.f32.mrf.mxu3  ;;  %701 = vmatmul.msk.f32.gmra.mxu1 %vm128_vm0, %v65_v15 }
  0xcf   :  { %v308_v19 = vpop.f32.mrf.mxu0 }
  0xd0   :  { %v1196_v22 = vadd.f32 %v469_v49, %v308_v19 }
  0xd2   :  { %355 = vmatmul.f32.gmra.mxu0 %v58_v20  ;;  %424 = vmatmul.f32.gmra.mxu2 %v104_v21 }
  0xd3   :  { %723 = vmatmul.msk.f32.gmra.mxu3 %vm128_vm0, %v109_v23  ;;  %v481_v24 = vpop.f32.mrf.mxu1 }
  0xd5   :  { %v377_v25 = vpop.f32.mrf.mxu2 }
  0xd6   :  { %v1202_v26 = vadd.f32 %v538_v8, %v377_v25  ;;  %v544_v27 = vpop.f32.mrf.mxu3 }
  0xd7   :  { %v311_v28 = vpop.f32.mrf.mxu0 }
  0xd8   :  { %v1207_v31 = vadd.f32 %v472_v58, %v311_v28 }
  0xda   :  { %427 = vmatmul.f32.gmra.mxu2 %v106_v30 }
  0xdb   :  { %v484_v32 = vpop.f32.mrf.mxu1 }
  0xdd   :  { %v380_v35 = vpop.f32.mrf.mxu2 }
  0xde   :  { %v1209_v36 = vadd.f32 %v541_v18, %v380_v35  ;;  %v547_v37 = vpop.f32.mrf.mxu3 }
  0xdf   :  { %v314_v39 = vpop.f32.mrf.mxu0 }
  0xe0   :  { %v1211_v40 = vadd.f32 %v475_v4, %v314_v39 }
  0xe3   :  { %v487_v41 = vpop.f32.mrf.mxu1 }
  0xe5   :  { %v383_v43 = vpop.f32.mrf.mxu2 }
  0xe6   :  { %v1213_v44 = vadd.f32 %v544_v27, %v383_v43  ;;  %v550_v45 = vpop.f32.mrf.mxu3 }
  0xe7   :  { %v317_v46 = vpop.f32.mrf.mxu0 }
  0xe8   :  { %v1215_v48 = vadd.f32 %v478_v14, %v317_v46 }
  0xeb   :  { %v490_v49 = vpop.f32.mrf.mxu1 }
  0xed   :  { %v386_v50 = vpop.f32.mrf.mxu2 }
  0xee   :  { %v1217_v52 = vadd.f32 %v547_v37, %v386_v50  ;;  %v553_v53 = vpop.f32.mrf.mxu3 }
  0xef   :  { %v320_v54 = vpop.f32.mrf.mxu0 }
  0xf0   :  { %v1219_v55 = vadd.f32 %v481_v24, %v320_v54 }
  0xf3   :  { %v493_v57 = vpop.f32.mrf.mxu1 }
  0xf5   :  { %v389_v58 = vpop.f32.mrf.mxu2 }
  0xf6   :  { %v1221_v59 = vadd.f32 %v550_v45, %v389_v58  ;;  %v556_v60 = vpop.f32.mrf.mxu3  ;;  %v1250_v45 = vld [vmem:[%s1355_s2] ss:$0 sm:$0xff] }
  0xf7   :  { %v323_v62 = vpop.f32.mrf.mxu0 }
  0xf8   :  { %v1223_v63 = vadd.f32 %v484_v32, %v323_v62 }
  0xfb   :  { %v496_v0 = vpop.f32.mrf.mxu1 }
  0xfd   :  { %v392_v1 = vpop.f32.mrf.mxu2 }
  0xfe   :  { %v1225_v3 = vadd.f32 %v553_v53, %v392_v1  ;;  %v1227_v4 = vpop.f32.mrf.mxu3 }
  0xff   :  { %v326_v5 = vpop.f32.mrf.mxu0 }
 0x100   :  { %v1229_v6 = vadd.f32 %v487_v41, %v326_v5 }
 0x102   :  { %v595_v8 = vmax.f32 %v1086_v29, %v1229_v6 }
 0x103   :  { %v499_v9 = vpop.f32.mrf.mxu1 }
 0x105   :  { %v395_v10 = vpop.f32.mrf.mxu2 }
 0x106   :  { %v1233_v11 = vadd.f32 %v556_v60, %v395_v10  ;;  %v1235_v13 = vpop.f32.mrf.mxu3 }
 0x107   :  { %v329_v14 = vpop.f32.mrf.mxu0 }
 0x108   :  { %v1237_v15 = vadd.f32 %v490_v49, %v329_v14 }
 0x10a   :  { %v596_v16 = vmax.f32 %v1106_v38, %v1237_v15 }
 0x10b   :  { %v502_v18 = vpop.f32.mrf.mxu1 }
 0x10d   :  { %v1241_v19 = vpop.f32.mrf.mxu2 }
 0x10e   :  { %v565_v20 = vpop.f32.mrf.mxu3 }
 0x10f   :  { %v332_v21 = vpop.f32.mrf.mxu0 }
 0x110   :  { %v494_v30 = vadd.f32 %v493_v57, %v332_v21 }
 0x112   :  { %v597_v41 = vmax.f32 %v1124_v47, %v494_v30 }
 0x113   :  { %v505_v23 = vpop.f32.mrf.mxu1 }
 0x115   :  { %v1243_v24 = vpop.f32.mrf.mxu2 }
 0x116   :  { %v568_v25 = vpop.f32.mrf.mxu3 }
 0x117   :  { %v335_v27 = vpop.f32.mrf.mxu0 }
 0x118   :  { %v497_v50 = vadd.f32 %v496_v0, %v335_v27 }
 0x11a   :  { %v598_v47 = vmax.f32 %v1142_v56, %v497_v50 }
 0x11b   :  { %v508_v28 = vpop.f32.mrf.mxu1 }
 0x11d   :  { %v404_v32 = vpop.f32.mrf.mxu2 }
 0x11e   :  { %v566_v35 = vadd.f32 %v565_v20, %v404_v32  ;;  %v571_v37 = vpop.f32.mrf.mxu3 }
 0x11f   :  { %v338_v39 = vpop.f32.mrf.mxu0 }
 0x120   :  { %v609_v43 = vmax.f32 %v1151_v61, %v566_v35  ;;  %v500_v0 = vadd.f32 %v499_v9, %v338_v39 }
 0x122   :  { %v621_v46 = vmax.f32 %v597_v41, %v609_v43  ;;  %v599_v27 = vmax.f32 %v1160_v2, %v500_v0 }
 0x123   :  { %v1252_v49 = vpop.f32.mrf.mxu1 }
 0x124   :  { %v637_v53 = vadd.f32 %v1250_v45, %v621_v46 }
 0x125   :  { %v407_v54 = vpop.f32.mrf.mxu2 }
 0x126   :  { %v649_v57 = vmax.f32 %v637_v53, 0.0  ;;  %v569_v58 = vadd.f32 %v568_v25, %v407_v54  ;;  %v574_v60 = vpop.f32.mrf.mxu3 }
 0x127   :  { %v341_v62 = vpop.f32.mrf.mxu0 }
 0x128   :  { %662 = vst.msk [vmem:[%s1356_s3 + $0x10] sm:$0xff] %vm659_vm1, %v649_v57  ;;  %v610_v61 = vmax.f32 %v1169_v7, %v569_v58  ;;  %v503_v9 = vadd.f32 %v502_v18, %v341_v62 }
 0x12a   :  { %v622_v1 = vmax.f32 %v598_v47, %v610_v61  ;;  %v600_v2 = vmax.f32 %v1178_v12, %v503_v9 }
 0x12b   :  { %v1261_v5 = vpop.f32.mrf.mxu1 }
 0x12c   :  { %v638_v10 = vadd.f32 %v1250_v45, %v622_v1 }
 0x12d   :  { %v410_v14 = vpop.f32.mrf.mxu2 }
 0x12e   :  { %v650_v20 = vmax.f32 %v638_v10, 0.0  ;;  %v572_v21 = vadd.f32 %v571_v37, %v410_v14  ;;  %v577_v25 = vpop.f32.mrf.mxu3 }
 0x12f   :  { %v344_v7 = vpop.f32.mrf.mxu0 }
 0x130   :  { %663 = vst.msk [vmem:[%s1356_s3 + $0x18] sm:$0xff] %vm659_vm1, %v650_v20  ;;  %v611_v56 = vmax.f32 %v1187_v17, %v572_v21  ;;  %v506_v54 = vadd.f32 %v505_v23, %v344_v7  ;;  %v560_v23 = vadd.f32 %v1227_v4, %v1241_v19 }
 0x132   :  { %v623_v30 = vmax.f32 %v599_v27, %v611_v56  ;;  %v601_v47 = vmax.f32 %v1196_v22, %v506_v54 }
 0x133   :  { %v1270_v32 = vpop.f32.mrf.mxu1 }
 0x134   :  { %v639_v35 = vadd.f32 %v1250_v45, %v623_v30 }
 0x135   :  { %v413_v39 = vpop.f32.mrf.mxu2 }
 0x136   :  { %v651_v41 = vmax.f32 %v639_v35, 0.0  ;;  %v575_v37 = vadd.f32 %v574_v60, %v413_v39  ;;  %v580_v43 = vpop.f32.mrf.mxu3 }
 0x137   :  { %v347_v50 = vpop.f32.mrf.mxu0 }
 0x138   :  { %664 = vst.msk [vmem:[%s1356_s3 + $0x20] sm:$0xff] %vm659_vm1, %v651_v41  ;;  %v612_v17 = vmax.f32 %v1202_v26, %v575_v37  ;;  %v509_v1 = vadd.f32 %v508_v28, %v347_v50  ;;  %v563_v28 = vadd.f32 %v1235_v13, %v1243_v24 }
 0x13a   :  { %v624_v46 = vmax.f32 %v600_v2, %v612_v17  ;;  %v602_v56 = vmax.f32 %v1207_v31, %v509_v1 }
 0x13b   :  { %v520_v53 = vpop.f32.mrf.mxu1 }
 0x13c   :  { %v640_v18 = vadd.f32 %v1250_v45, %v624_v46 }
 0x13d   :  { %v416_v57 = vpop.f32.mrf.mxu2 }
 0x13e   :  { %v652_v58 = vmax.f32 %v640_v18, 0.0  ;;  %v578_v62 = vadd.f32 %v577_v25, %v416_v57  ;;  %v583_v60 = vpop.f32.mrf.mxu3 }
 0x13f   :  { %v350_v14 = vpop.f32.mrf.mxu0 }
 0x140   :  { %665 = vst.msk [vmem:[%s1356_s3 + $0x28] sm:$0xff] %vm659_vm1, %v652_v58  ;;  %v613_v12 = vmax.f32 %v1209_v36, %v578_v62  ;;  %v512_v31 = vadd.f32 %v1252_v49, %v350_v14 }
 0x142   :  { %v625_v26 = vmax.f32 %v601_v47, %v613_v12  ;;  %v603_v13 = vmax.f32 %v1211_v40, %v512_v31  ;;  %v521_v40 = vadd.f32 %v520_v53, %v1095_v33 }
 0x143   :  { %v523_v61 = vpop.f32.mrf.mxu1 }
 0x144   :  { %v641_v0 = vadd.f32 %v1250_v45, %v625_v26  ;;  %v524_v10 = vadd.f32 %v523_v61, %v1115_v42 }
 0x145   :  { %v419_v20 = vpop.f32.mrf.mxu2 }
 0x146   :  { %v653_v22 = vmax.f32 %v641_v0, 0.0  ;;  %v607_v21 = vmax.f32 %v524_v10, %v560_v23  ;;  %v581_v25 = vadd.f32 %v580_v43, %v419_v20  ;;  %v586_v27 = vpop.f32.mrf.mxu3 }
 0x147   :  { %v353_v41 = vpop.f32.mrf.mxu0 }
 0x148   :  { %666 = vst.msk [vmem:[%s1356_s3 + $0x30] sm:$0xff] %vm659_vm1, %v653_v22  ;;  %v619_v36 = vmax.f32 %v595_v8, %v607_v21  ;;  %v614_v4 = vmax.f32 %v1213_v44, %v581_v25  ;;  %v515_v43 = vadd.f32 %v1261_v5, %v353_v41  ;;  %v606_v5 = vmax.f32 %v1223_v63, %v521_v40 }
 0x14a   :  { %v635_v42 = vadd.f32 %v1250_v45, %v619_v36  ;;  %v626_v19 = vmax.f32 %v602_v56, %v614_v4  ;;  %v604_v50 = vmax.f32 %v1215_v48, %v515_v43 }
 0x14b   :  { %v526_v7 = vpop.f32.mrf.mxu1 }
 0x14c   :  { %v647_v30 = vmax.f32 %v635_v42, 0.0  ;;  %v642_v9 = vadd.f32 %v1250_v45, %v626_v19  ;;  %v527_v35 = vadd.f32 %v526_v7, %v1133_v51 }
 0x14d   :  { %v422_v39 = vpop.f32.mrf.mxu2 }
 0x14e   :  { %660 = vst.msk [vmem:[%s1356_s3] sm:$0xff] %vm659_vm1, %v647_v30  ;;  %v654_v29 = vmax.f32 %v642_v9, 0.0  ;;  %v608_v44 = vmax.f32 %v527_v35, %v563_v28  ;;  %v584_v6 = vadd.f32 %v583_v60, %v422_v39  ;;  %v589_v8 = vpop.f32.mrf.mxu3 }
 0x14f   :  { %v356_v53 = vpop.f32.mrf.mxu0 }
 0x150   :  { %667 = vst.msk [vmem:[%s1356_s3 + $0x38] sm:$0xff] %vm659_vm1, %v654_v29  ;;  %v620_v51 = vmax.f32 %v596_v16, %v608_v44  ;;  %v615_v24 = vmax.f32 %v1217_v52, %v584_v6  ;;  %v518_v58 = vadd.f32 %v1270_v32, %v356_v53 }
 0x152   :  { %v636_v49 = vadd.f32 %v1250_v45, %v620_v51  ;;  %v627_v37 = vmax.f32 %v603_v13, %v615_v24  ;;  %v605_v26 = vmax.f32 %v1219_v55, %v518_v58 }
 0x154   :  { %v648_v2 = vmax.f32 %v636_v49, 0.0  ;;  %v643_v17 = vadd.f32 %v1250_v45, %v627_v37 }
 0x155   :  { %v425_v46 = vpop.f32.mrf.mxu2 }
 0x156   :  { %661 = vst.msk [vmem:[%s1356_s3 + $0x8] sm:$0xff] %vm659_vm1, %v648_v2  ;;  %v655_v38 = vmax.f32 %v643_v17, 0.0  ;;  %v587_v15 = vadd.f32 %v586_v27, %v425_v46  ;;  %v592_v16 = vpop.f32.mrf.mxu3 }
 0x157   :  { %v593_v52 = vadd.f32 %v592_v16, %v1097_v34 }
 0x158   :  { %668 = vst.msk [vmem:[%s1356_s3 + $0x40] sm:$0xff] %vm659_vm1, %v655_v38  ;;  %v616_v33 = vmax.f32 %v1221_v59, %v587_v15 }
 0x159   :  { %v618_v54 = vmax.f32 %v1233_v11, %v593_v52 }
 0x15a   :  { %v628_v18 = vmax.f32 %v604_v50, %v616_v33 }
 0x15b   :  { %v630_v57 = vmax.f32 %v606_v5, %v618_v54 }
 0x15c   :  { %v644_v34 = vadd.f32 %v1250_v45, %v628_v18 }
 0x15d   :  { %v646_v48 = vadd.f32 %v1250_v45, %v630_v57  ;;  %v428_v62 = vpop.f32.mrf.mxu2 }
 0x15e   :  { %v656_v60 = vmax.f32 %v644_v34, 0.0  ;;  %v590_v47 = vadd.f32 %v589_v8, %v428_v62 }
 0x15f   :  { %v658_v12 = vmax.f32 %v646_v48, 0.0 }
 0x160   :  { %669 = vst.msk [vmem:[%s1356_s3 + $0x48] sm:$0xff] %vm659_vm1, %v656_v60  ;;  %v617_v59 = vmax.f32 %v1225_v3, %v590_v47 }
 0x161   :  { %671 = vst.msk [vmem:[%s1356_s3 + $0x58] sm:$0xff] %vm659_vm1, %v658_v12 }
 0x162   :  { %v629_v63 = vmax.f32 %v605_v26, %v617_v59 }
 0x164   :  { %v645_v11 = vadd.f32 %v1250_v45, %v629_v63 }
 0x166   :  { %v657_v32 = vmax.f32 %v645_v11, 0.0 }
 0x168   :  { %670 = vst.msk [vmem:[%s1356_s3 + $0x50] sm:$0xff] %vm659_vm1, %v657_v32 }

// kernel: lenet5_forward.3
= control target key start
LH: loop header
LB: loop body
LE: loop exit
PB: predicated region body
PF: predicated region fallthrough
CT: control target
= control target key end

     0   :  { %vm81_vm0 = vcmask 1043456   ;;  %s655_s0 = inlined_call_operand.vmem [shape: f32[8,324], index: 0, kind: input, shape index: {}]   ;;  %s656_s1 = inlined_call_operand.vmem [shape: f32[324,96], index: 1, kind: input, shape index: {}]   ;;  %s657_s2 = inlined_call_operand.vmem [shape: f32[1,96], index: 2, kind: input, shape index: {}]   ;;  %s658_s3 = inlined_call_operand.vmem [shape: f32[96,120], index: 3, kind: input, shape index: {}]   ;;  %s659_s4 = inlined_call_operand.vmem [shape: f32[1,120], index: 4, kind: input, shape index: {}]   ;;  %s660_s5 = inlined_call_operand.vmem [shape: f32[120,84], index: 5, kind: input, shape index: {}]   ;;  %s661_s6 = inlined_call_operand.vmem [shape: f32[1,84], index: 6, kind: input, shape index: {}]   ;;  %s662_s7 = inlined_call_operand.vmem [shape: f32[84,20], index: 7, kind: input, shape index: {}]   ;;  %s663_s8 = inlined_call_operand.vmem [shape: f32[1,20], index: 8, kind: input, shape index: {}]   ;;  %s664_s9 = inlined_call_operand.hbm [shape: f32[2,20], index: 9, kind: output, shape index: {}]  }
   0x1   :  { %v51_v0 = vld [vmem:[%s656_s1 + $0x78] sm:$0xff]  ;;  %v50_v2 = vld [vmem:[%s656_s1 + $0x70] sm:$0xff]  ;;  %v49_v4 = vld [vmem:[%s656_s1 + $0x68] sm:$0xff] }
   0x2   :  { %v67_v1 = vld [vmem:[%s656_s1 + $0xf8] sm:$0xff]  ;;  %85 = vmatpush.msra.mxu0 %v51_v0  ;;  %v66_v3 = vld [vmem:[%s656_s1 + $0xf0] sm:$0xff]  ;;  %v65_v5 = vld [vmem:[%s656_s1 + $0xe8] sm:$0xff] }
   0x3   :  { %105 = vmatpush.msra.mxu1 %v67_v1  ;;  %v48_v6 = vld [vmem:[%s656_s1 + $0x60] sm:$0xff]  ;;  %v75_v9 = vld [vmem:[%s656_s1 + $0x138] sm:$0xff]  ;;  %v74_v12 = vld [vmem:[%s656_s1 + $0x130] sm:$0xff] }
   0x4   :  { %86 = vmatpush.msra.mxu0 %v50_v2  ;;  %v64_v7 = vld [vmem:[%s656_s1 + $0xe0] sm:$0xff]  ;;  %v47_v10 = vld [vmem:[%s656_s1 + $0x58] sm:$0xff]  ;;  %v46_v13 = vld [vmem:[%s656_s1 + $0x50] sm:$0xff] }
   0x5   :  { %106 = vmatpush.msra.mxu1 %v66_v3  ;;  %v76_v8 = vld [vmem:[%s656_s1 + $0x140] sm:$0xf]  ;;  %v63_v11 = vld [vmem:[%s656_s1 + $0xd8] sm:$0xff]  ;;  %v62_v14 = vld [vmem:[%s656_s1 + $0xd0] sm:$0xff] }
   0x6   :  { %87 = vmatpush.msra.mxu0 %v49_v4  ;;  %304 = vmatpush.msk.msra.mxu2 %vm81_vm0, %v76_v8  ;;  %v73_v15 = vld [vmem:[%s656_s1 + $0x128] sm:$0xff]  ;;  %v72_v18 = vld [vmem:[%s656_s1 + $0x120] sm:$0xff]  ;;  %v43_v21 = vld [vmem:[%s656_s1 + $0x38] sm:$0xff] }
   0x7   :  { %107 = vmatpush.msra.mxu1 %v65_v5  ;;  %v45_v16 = vld [vmem:[%s656_s1 + $0x48] sm:$0xff]  ;;  %v44_v19 = vld [vmem:[%s656_s1 + $0x40] sm:$0xff]  ;;  %v59_v22 = vld [vmem:[%s656_s1 + $0xb8] sm:$0xff] }
   0x8   :  { %88 = vmatpush.msra.mxu0 %v48_v6  ;;  %133 = vmatpush.msra.mxu2 %v75_v9  ;;  %v61_v17 = vld [vmem:[%s656_s1 + $0xc8] sm:$0xff]  ;;  %v60_v20 = vld [vmem:[%s656_s1 + $0xc0] sm:$0xff]  ;;  %v71_v23 = vld [vmem:[%s656_s1 + $0x118] sm:$0xff] }
   0x9   :  { %108 = vmatpush.msra.mxu1 %v64_v7  ;;  %v42_v24 = vld [vmem:[%s656_s1 + $0x30] sm:$0xff]  ;;  %v170_v26 = vld [vmem:[%s658_s3 + $0x58] sm:$0xff]  ;;  %v69_v29 = vld [vmem:[%s656_s1 + $0x108] sm:$0xff] }
   0xa   :  { %89 = vmatpush.msra.mxu0 %v47_v10  ;;  %134 = vmatpush.msra.mxu2 %v74_v12  ;;  %v58_v25 = vld [vmem:[%s656_s1 + $0xb0] sm:$0xff]  ;;  %v168_v30 = vld [vmem:[%s658_s3 + $0x48] sm:$0xff] }
   0xb   :  { %109 = vmatpush.msra.mxu1 %v63_v11  ;;  %v70_v27 = vld [vmem:[%s656_s1 + $0x110] sm:$0xff]  ;;  %183 = vmatpush.msra.mxu3 %v170_v26 }
   0xc   :  { %90 = vmatpush.msra.mxu0 %v46_v13  ;;  %135 = vmatpush.msra.mxu2 %v73_v15  ;;  %v169_v28 = vld [vmem:[%s658_s3 + $0x50] sm:$0xff] }
   0xd   :  { %110 = vmatpush.msra.mxu1 %v62_v14 }
   0xe   :  { %91 = vmatpush.msra.mxu0 %v45_v16  ;;  %136 = vmatpush.msra.mxu2 %v72_v18 }
   0xf   :  { %111 = vmatpush.msra.mxu1 %v61_v17 }
  0x10   :  { %92 = vmatpush.msra.mxu0 %v44_v19  ;;  %137 = vmatpush.msra.mxu2 %v71_v23 }
  0x11   :  { %112 = vmatpush.msra.mxu1 %v60_v20 }
  0x12   :  { %93 = vmatpush.msra.mxu0 %v43_v21 }
  0x13   :  { %113 = vmatpush.msra.mxu1 %v59_v22 }
  0x14   :  { %14 = vsyncpa [#allocation3], 0  ;;  %v41_v31 = vld [vmem:[%s656_s1 + $0x28] sm:$0xff]  ;;  %138 = vmatpush.msra.mxu2 %v70_v27  ;;  %184 = vmatpush.msra.mxu3 %v169_v28  ;;  %v68_v33 = vld [vmem:[%s656_s1 + $0x100] sm:$0xff]  ;;  %vm77_vm1 = vcmask 556032   ;;  %vm175_vm2 = vcmask 785408  }
  0x15   :  { %v57_v32 = vld [vmem:[%s656_s1 + $0xa8] sm:$0xff]  ;;  %94 = vmatpush.msra.mxu0 %v42_v24  ;;  %114 = vmatpush.msra.mxu1 %v58_v25  ;;  %v40_v34 = vld [vmem:[%s656_s1 + $0x20] sm:$0xff]  ;;  %v35_v36 = vld [vmem:[%s655_s0 + $0x10] sm:$0xff]  ;;  %vm219_vm3 = vcmask 982016   ;;  %vm259_vm4 = vcmask 687104   ;;  %vm286_vm5 = vcmask 156672  }
  0x16   :  { %v56_v35 = vld [vmem:[%s656_s1 + $0xa0] sm:$0xff]  ;;  %139 = vmatpush.msra.mxu2 %v69_v29  ;;  %185 = vmatpush.msra.mxu3 %v168_v30  ;;  %v39_v37 = vld [vmem:[%s656_s1 + $0x18] sm:$0xff]  ;;  %v38_v39 = vld [vmem:[%s656_s1 + $0x10] sm:$0xff] }
  0x17   :  { %95 = vmatpush.msra.mxu0 %v41_v31  ;;  %115 = vmatpush.msra.mxu1 %v57_v32  ;;  %v55_v38 = vld [vmem:[%s656_s1 + $0x98] sm:$0xff]  ;;  %v54_v40 = vld [vmem:[%s656_s1 + $0x90] sm:$0xff]  ;;  %v37_v41 = vld [vmem:[%s656_s1 + $0x8] sm:$0xff] }
  0x18   :  { %140 = vmatpush.msra.mxu2 %v68_v33  ;;  %v53_v42 = vld [vmem:[%s656_s1 + $0x88] sm:$0xff]  ;;  %v36_v43 = vld [vmem:[%s656_s1] sm:$0xff]  ;;  %v166_v48 = vld [vmem:[%s658_s3 + $0x38] sm:$0xff] }
  0x19   :  { %96 = vmatpush.msra.mxu0 %v40_v34  ;;  %116 = vmatpush.msra.mxu1 %v56_v35  ;;  %v52_v44 = vld [vmem:[%s656_s1 + $0x80] sm:$0xff]  ;;  %v34_v46 = vld [vmem:[%s655_s0 + $0x8] sm:$0xff]  ;;  %v165_v49 = vld [vmem:[%s658_s3 + $0x30] sm:$0xff] }
  0x1a   :  { %305 = vmatmul.msk.f32.vlgmr.msra.gmra.mxu2 %vm77_vm1, %v35_v36  ;;  %v33_v45 = vld [vmem:[%s655_s0] sm:$0xff]  ;;  %v164_v50 = vld [vmem:[%s658_s3 + $0x28] sm:$0xff]  ;;  %v162_v52 = vld [vmem:[%s658_s3 + $0x18] sm:$0xff] }
  0x1b   :  { %97 = vmatpush.msra.mxu0 %v39_v37  ;;  %117 = vmatpush.msra.mxu1 %v55_v38  ;;  %v167_v47 = vld [vmem:[%s658_s3 + $0x40] sm:$0xff]  ;;  %v161_v53 = vld [vmem:[%s658_s3 + $0x10] sm:$0xff]  ;;  %v160_v54 = vld [vmem:[%s658_s3 + $0x8] sm:$0xff] }
  0x1c   :  { %186 = vmatpush.msra.mxu3 %v167_v47  ;;  %v163_v51 = vld [vmem:[%s658_s3 + $0x20] sm:$0xff]  ;;  %v214_v56 = vld [vmem:[%s660_s5 + $0x70] sm:$0xff]  ;;  %v213_v57 = vld [vmem:[%s660_s5 + $0x68] sm:$0xff] }
  0x1d   :  { %98 = vmatpush.msra.mxu0 %v38_v39  ;;  %118 = vmatpush.msra.mxu1 %v54_v40  ;;  %v159_v55 = vld [vmem:[%s658_s3] sm:$0xff]  ;;  %v211_v59 = vld [vmem:[%s660_s5 + $0x58] sm:$0xff]  ;;  %v210_v60 = vld [vmem:[%s660_s5 + $0x50] sm:$0xff]  ;;  %s341_s3 = smov [#allocation2]  }
  0x1e   :  { %187 = vmatpush.msra.mxu3 %v166_v48  ;;  %224 = vmatpush.msrb.mxu2 %v214_v56  ;;  %v212_v58 = vld [vmem:[%s660_s5 + $0x60] sm:$0xff]  ;;  %v209_v61 = vld [vmem:[%s660_s5 + $0x48] sm:$0xff]  ;;  %v207_v63 = vld [vmem:[%s660_s5 + $0x38] sm:$0xff]  ;;  %s293_s21 = sshll.u32 %s341_s3, 4  ;;  %s294_s21 = int_to_ptr.vmem [resolvable:$true] %s293_s21 }
  0x1f   :  { %99 = vmatpush.msra.mxu0 %v37_v41  ;;  %119 = vmatpush.msra.mxu1 %v53_v42  ;;  %v208_v62 = vld [vmem:[%s660_s5 + $0x40] sm:$0xff]  ;;  %v206_v1 = vld [vmem:[%s660_s5 + $0x30] sm:$0xff]  ;;  %v205_v5 = vld [vmem:[%s660_s5 + $0x28] sm:$0xff] }
  0x20   :  { %188 = vmatpush.msra.mxu3 %v165_v49  ;;  %225 = vmatpush.msrb.mxu2 %v213_v57  ;;  %v204_v7 = vld [vmem:[%s660_s5 + $0x20] sm:$0xff]  ;;  %v203_v9 = vld [vmem:[%s660_s5 + $0x18] sm:$0xff]  ;;  %v202_v16 = vld [vmem:[%s660_s5 + $0x10] sm:$0xff] }
  0x21   :  { %100 = vmatpush.msra.mxu0 %v36_v43  ;;  %120 = vmatpush.msra.mxu1 %v52_v44  ;;  %v311_v12 = vld [vmem:[%s657_s2] ss:$0 sm:$0xff]  ;;  %v201_v17 = vld [vmem:[%s660_s5 + $0x8] sm:$0xff]  ;;  %v254_v19 = vld [vmem:[%s662_s7 + $0x50] sm:$0xf] }
  0x22   :  { %101 = vmatmul.f32.vlgmr.msra.gmra.mxu0 %v33_v45  ;;  %121 = vmatmul.f32.vlgmr.msra.gmra.mxu1 %v34_v46  ;;  %v200_v18 = vld [vmem:[%s660_s5] sm:$0xff]  ;;  %v253_v20 = vld [vmem:[%s662_s7 + $0x48] sm:$0xff]  ;;  %v251_v22 = vld [vmem:[%s662_s7 + $0x38] sm:$0xff] }
  0x23   :  { %189 = vmatpush.msra.mxu3 %v164_v50  ;;  %226 = vmatpush.msrb.mxu2 %v212_v58  ;;  %v252_v21 = vld [vmem:[%s662_s7 + $0x40] sm:$0xff]  ;;  %v250_v23 = vld [vmem:[%s662_s7 + $0x30] sm:$0xff]  ;;  %v249_v24 = vld [vmem:[%s662_s7 + $0x28] sm:$0xff] }
  0x24   :  { %v248_v25 = vld [vmem:[%s662_s7 + $0x20] sm:$0xff]  ;;  %v247_v26 = vld [vmem:[%s662_s7 + $0x18] sm:$0xff]  ;;  %v246_v31 = vld [vmem:[%s662_s7 + $0x10] sm:$0xff] }
  0x25   :  { %190 = vmatpush.msra.mxu3 %v163_v51  ;;  %227 = vmatpush.msrb.mxu2 %v211_v59  ;;  %v312_v27 = vld [vmem:[%s659_s4] ss:$0 sm:$0xff]  ;;  %v245_v32 = vld [vmem:[%s662_s7 + $0x8] sm:$0xff] }
  0x26   :  { %v244_v33 = vld [vmem:[%s662_s7] sm:$0xff]  ;;  %s295_s7 = sshll.u32 %s664_s9, 4  ;;  %s296_s7 = int_to_ptr.hbm [resolvable:$true] %s295_s7 }
  0x27   :  { %191 = vmatpush.msra.mxu3 %v162_v52  ;;  %228 = vmatpush.msrb.mxu2 %v210_v60  ;;  %v313_v34 = vld [vmem:[%s661_s6] ss:$0 sm:$0xff] }
  0x28   :  { %v314_v38 = vld [vmem:[%s663_s8] ss:$0 sm:$0xff] }
  0x29   :  { %192 = vmatpush.msra.mxu3 %v161_v53  ;;  %229 = vmatpush.msrb.mxu2 %v209_v61 }
  0x2b   :  { %193 = vmatpush.msra.mxu3 %v160_v54  ;;  %230 = vmatpush.msrb.mxu2 %v208_v62 }
  0x2d   :  { %194 = vmatpush.msra.mxu3 %v159_v55  ;;  %231 = vmatpush.msrb.mxu2 %v207_v63 }
  0x2f   :  { %232 = vmatpush.msrb.mxu2 %v206_v1  ;;  %308 = vmatpush.msk.msrb.mxu3 %vm81_vm0, %v254_v19 }
  0x31   :  { %233 = vmatpush.msrb.mxu2 %v205_v5  ;;  %272 = vmatpush.msrb.mxu3 %v253_v20 }
  0x33   :  { %234 = vmatpush.msrb.mxu2 %v204_v7  ;;  %273 = vmatpush.msrb.mxu3 %v252_v21 }
  0x35   :  { %235 = vmatpush.msrb.mxu2 %v203_v9  ;;  %274 = vmatpush.msrb.mxu3 %v251_v22 }
  0x37   :  { %236 = vmatpush.msrb.mxu2 %v202_v16  ;;  %275 = vmatpush.msrb.mxu3 %v250_v23 }
  0x39   :  { %237 = vmatpush.msrb.mxu2 %v201_v17  ;;  %276 = vmatpush.msrb.mxu3 %v249_v24 }
  0x3b   :  { %238 = vmatpush.msrb.mxu2 %v200_v18  ;;  %277 = vmatpush.msrb.mxu3 %v248_v25 }
  0x3d   :  { %278 = vmatpush.msrb.mxu3 %v247_v26 }
  0x3f   :  { %279 = vmatpush.msrb.mxu3 %v246_v31 }
  0x41   :  { %280 = vmatpush.msrb.mxu3 %v245_v32 }
  0x43   :  { %281 = vmatpush.msrb.mxu3 %v244_v33 }
  0x9d   :  { %v142_v0 = vpop.f32.mrf.mxu2 }
  0x9f   :  { %v102_v2 = vpop.f32.mrf.mxu0  ;;  %v122_v3 = vpop.f32.mrf.mxu1 }
  0xa0   :  { %v123_v4 = vadd.f32 %v122_v3, %v102_v2 }
  0xa2   :  { %v143_v6 = vadd.f32 %v142_v0, %v123_v4 }
  0xa4   :  { %v146_v8 = vrot.slane %v143_v6, 2 }
  0xa6   :  { %v148_v10 = vmax.f32 %v143_v6, %v146_v8 }
  0xa8   :  { %v150_v11 = vrot.slane %v148_v10, 4 }
  0xaa   :  { %v152_v13 = vmax.f32 %v148_v10, %v150_v11 }
  0xac   :  { %v157_v14 = vadd.f32 %v311_v12, %v152_v13 }
  0xae   :  { %v158_v15 = vmax.f32 %v157_v14, 0.0 }
  0xb0   :  { %306 = vmatmul.msk.f32.vlgmr.msra.gmra.mxu3 %vm175_vm2, %v158_v15 }
 0x133   :  { %v196_v28 = vpop.f32.mrf.mxu3 }
 0x134   :  { %v197_v29 = vadd.f32 %v312_v27, %v196_v28 }
 0x136   :  { %v199_v30 = vmax.f32 %v197_v29, 0.0 }
 0x138   :  { %307 = vmatmul.msk.f32.vlgmr.msrb.gmra.mxu2 %vm219_vm3, %v199_v30 }
 0x1bb   :  { %v240_v35 = vpop.f32.mrf.mxu2 }
 0x1bc   :  { %v241_v36 = vadd.f32 %v313_v34, %v240_v35 }
 0x1be   :  { %v243_v37 = vmax.f32 %v241_v36, 0.0 }
 0x1c0   :  { %309 = vmatmul.msk.f32.vlgmr.msrb.gmra.mxu3 %vm259_vm4, %v243_v37 }
 0x243   :  { %v283_v39 = vpop.f32.mrf.mxu3 }
 0x244   :  { %v284_v40 = vadd.f32 %v314_v38, %v283_v39 }
 0x246   :  { %287 = vst.msk [vmem:[#allocation2] sm:$0x3] %vm286_vm5, %v284_v40 }
 0x247   :  { %298 = dma.vmem_to_hbm [thread:$0]  %s294_s21, 32, %s296_s7, [#allocation3]  }
 0x248   :  { %339 = dma.done.wait [#allocation3], 32  }
 0x249   :  { %340 = vsyncadd [#allocation3], 4294967264 }
 0x24a   :  { %303 = vsyncpa [#allocation3], 1 }

</bundles_post_ra>
